<compile_context>
chip_gen: v6e
topology: v6e:2x2x1
jax: 0.10.0
libtpu: 0.0.40
codegen_flags: <defaults>
</compile_context>

<pallas_src>
import jax
import jax.numpy as jnp
from jax.experimental import pallas as pl
from jax.experimental.pallas import tpu as pltpu


def attention_kernel(enc_ref, u_ref, out_ref):
    """One grid step == bt batch rows.

    enc_ref: (bt, S, H)  encoder outputs (streamed from HBM, the bound resource)
    u_ref:   (bt, H)     precomputed u = hidden @ W  (f32)
    out_ref: (bt, S)     softmax attention weights over the sequence axis
    """
    enc = enc_ref[...].astype(jnp.float32)                 # (bt, S, H)
    u = u_ref[...].astype(jnp.float32)                     # (bt, H)

    # s[b, t] = sum_h enc[b, t, h] * u[b, h]   (VPU multiply + lane reduce over H)
    s = jnp.sum(enc * u[:, None, :], axis=-1)              # (bt, S)

    # Exact softmax over the sequence axis (S is the lane dim -> lane-dense store).
    m = jnp.max(s, axis=-1, keepdims=True)
    e = jnp.exp(s - m)
    out_ref[...] = (e / jnp.sum(e, axis=-1, keepdims=True)).astype(out_ref.dtype)


def _device_budgets():
    """Return (per-buffer enc tile byte target, vmem_limit_bytes or None)."""
    try:
        kind = jax.devices()[0].device_kind.lower()
    except Exception:
        kind = ""
    if "v6" in kind:                 # v6e: 128 MiB VMEM physical, ~1.4 TB/s HBM
        return 6 << 20, 96 << 20
    if "v7" in kind or "tpu7" in kind:   # v7x: 64 MiB VMEM, ~3.2 TB/s HBM
        return 8 << 20, 48 << 20
    if "v5" in kind:                 # v5e: ~820 GB/s HBM; smaller tiles already amortize
        return 3 << 20, 28 << 20
    # Unknown backend / interpret mode: conservative tile, no VMEM-limit override.
    return 3 << 20, None


def attention_forward(hidden, encoder_output, weight, bias, *, tile_target_bytes=None):
    """hidden: (B,1,H), encoder_output: (B,S,H), weight: (H,H), bias: (H,) -> (B,S).

    The nn.Linear bias adds a per-row constant to every score (it does not depend on
    the sequence position), so it cancels exactly in softmax(dim=1) and is unused.
    """
    del bias  # cancels exactly in softmax over the sequence axis
    B, S, H = encoder_output.shape

    # Hoist the tiny projection out of the kernel:
    #   (enc @ W.T) @ hid.T == enc @ (hid @ W).T,   u = hid @ W  (B, H)
    u = jnp.dot(hidden.reshape(B, H), weight,
                preferred_element_type=jnp.float32).astype(jnp.float32)

    tile_target, vmem_limit = _device_budgets()
    if tile_target_bytes is not None:
        tile_target = tile_target_bytes

    # Batch tile: size the (double-buffered) enc block to the per-generation byte
    # target. Worst-case per-step VMEM ~ 2*tile (double buffer) + ~2*tile of f32
    # temps (upcast / product) + small u/out tiles, which fits the vmem_limit above.
    itemsize = jnp.dtype(encoder_output.dtype).itemsize
    row_bytes = S * H * itemsize
    bt = max(1, tile_target // row_bytes)
    if bt < B and B >= 16:
        bt = min(bt, B // 2)          # keep >= 2 grid steps (pipelining / megacore)
    if bt >= B:
        bt = B                        # single step: blocks equal full array dims
    else:
        bt = max(8, (bt // 8) * 8)    # sublane-aligned 2-D (bt,H)/(bt,S) blocks
        if bt >= B:
            bt = B
    grid = (B + bt - 1) // bt         # ragged last block: OOB reads are unspecified
                                      # but feed only rows whose writes are masked.

    params = {"dimension_semantics": ("parallel",)}
    if vmem_limit is not None:
        params["vmem_limit_bytes"] = vmem_limit

    out = pl.pallas_call(
        attention_kernel,
        out_shape=jax.ShapeDtypeStruct((B, S), jnp.float32),
        grid_spec=pltpu.PrefetchScalarGridSpec(
            num_scalar_prefetch=0,
            grid=(grid,),
            in_specs=[
                pl.BlockSpec((bt, S, H), lambda b: (b, 0, 0)),  # encoder_output tile
                pl.BlockSpec((bt, H), lambda b: (b, 0)),        # u = hid @ W tile
            ],
            out_specs=pl.BlockSpec((bt, S), lambda b: (b, 0)),  # lane-dense (bt, S)
        ),
        compiler_params=pltpu.CompilerParams(**params),
    )(encoder_output, u)

    return out                                            # (B, S)


def attention_reference(hidden, encoder_output, weight, bias):
    """Pure-JAX reference mirroring the PyTorch module exactly (bias included)."""
    scores = jnp.einsum("bsh,oh->bso", encoder_output, weight) + bias   # Linear
    s = jnp.einsum("bso,bo->bs", scores, hidden[:, 0, :])               # bmm + squeeze
    return jax.nn.softmax(s, axis=1)


if __name__ == "__main__":
    B, S, H = 2, 8, 32

    key = jax.random.PRNGKey(0)
    k_enc, k_hid, k_w, k_b = jax.random.split(key, 4)

    encoder_output = jax.random.normal(k_enc, (B, S, H), dtype=jnp.float32)
    hidden = jax.random.normal(k_hid, (B, 1, H), dtype=jnp.float32)

    # nn.Linear(H, H) default init: U(-1/sqrt(H), 1/sqrt(H)) for weight and bias
    bound = 1.0 / (H ** 0.5)
    weight = jax.random.uniform(k_w, (H, H), minval=-bound, maxval=bound, dtype=jnp.float32)
    bias = jax.random.uniform(k_b, (H,), minval=-bound, maxval=bound, dtype=jnp.float32)

    out = jax.block_until_ready(attention_forward(hidden, encoder_output, weight, bias))
    ref = attention_reference(hidden, encoder_output, weight, bias)
    assert out.shape == (B, S)
    assert jnp.allclose(out, ref, atol=1e-4, rtol=1e-4), "mismatch vs. reference"
    assert jnp.allclose(jnp.sum(out, axis=1), 1.0, atol=1e-4), "softmax rows must sum to 1"

    # Also exercise the multi-step path (grid > 1) with a ragged last block (B % bt != 0).
    B2, S2, H2 = 20, 16, 32
    k_enc2, k_hid2 = jax.random.split(k_b, 2)
    enc2 = jax.random.normal(k_enc2, (B2, S2, H2), dtype=jnp.float32)
    hid2 = jax.random.normal(k_hid2, (B2, 1, H2), dtype=jnp.float32)
    w2 = jax.random.uniform(k_w, (H2, H2), minval=-bound, maxval=bound, dtype=jnp.float32)
    b2 = jax.random.uniform(k_b, (H2,), minval=-bound, maxval=bound, dtype=jnp.float32)
    out2 = jax.block_until_ready(
        attention_forward(hid2, enc2, w2, b2, tile_target_bytes=4096))  # forces bt=8, grid=3
    ref2 = attention_reference(hid2, enc2, w2, b2)
    assert out2.shape == (B2, S2)
    assert jnp.allclose(out2, ref2, atol=1e-4, rtol=1e-4), "ragged-path mismatch vs. reference"

    print("KERNEL_OK")
</pallas_src>

<mosaic_0001>
module attributes {stable_mosaic.version = 11 : i64} {
  func.func @attention_kernel(%arg0: i32, %arg1: memref<2x8x32xf32, #tpu.memory_space<vmem>>, %arg2: memref<2x32xf32, #tpu.memory_space<vmem>>, %arg3: memref<2x8xf32, #tpu.memory_space<vmem>>) attributes {dimension_semantics = [#tpu.dimension_semantics<parallel>], iteration_bounds = array<i64: 1>, scalar_prefetch = 0 : i64, scratch_operands = 0 : i64, tpu.core_type = #tpu.core_type<tc>, window_params = [{transform_indices = @transform_0, window_bounds = array<i64: 2, 8, 32>}, {transform_indices = @transform_1, window_bounds = array<i64: 2, 32>}, {transform_indices = @transform_2, window_bounds = array<i64: 2, 8>}]} {
    %c0 = arith.constant 0 : index
    %c0_0 = arith.constant 0 : index
    %c0_1 = arith.constant 0 : index
    %0 = vector.load %arg1[%c0, %c0_0, %c0_1] : memref<2x8x32xf32, #tpu.memory_space<vmem>>, vector<2x8x32xf32>
    %c0_2 = arith.constant 0 : index
    %c0_3 = arith.constant 0 : index
    %1 = vector.load %arg2[%c0_2, %c0_3] : memref<2x32xf32, #tpu.memory_space<vmem>>, vector<2x32xf32>
    %2 = vector.shape_cast %1 : vector<2x32xf32> to vector<2x1x32xf32>
    %3 = vector.broadcast %2 : vector<2x1x32xf32> to vector<2x8x32xf32>
    %4 = arith.mulf %0, %3 : vector<2x8x32xf32>
    %cst = arith.constant dense<0.000000e+00> : vector<2x8xf32>
    %5 = vector.multi_reduction <add>, %4, %cst [2] : vector<2x8x32xf32> to vector<2x8xf32>
    %cst_4 = arith.constant dense<0xFF800000> : vector<2xf32>
    %6 = vector.multi_reduction <maximumf>, %5, %cst_4 [1] : vector<2x8xf32> to vector<2xf32>
    %7 = vector.shape_cast %6 : vector<2xf32> to vector<2x1xf32>
    %8 = vector.broadcast %7 : vector<2x1xf32> to vector<2x8xf32>
    %9 = arith.subf %5, %8 : vector<2x8xf32>
    %10 = math.exp %9 : vector<2x8xf32>
    %cst_5 = arith.constant dense<0.000000e+00> : vector<2xf32>
    %11 = vector.multi_reduction <add>, %10, %cst_5 [1] : vector<2x8xf32> to vector<2xf32>
    %12 = vector.shape_cast %11 : vector<2xf32> to vector<2x1xf32>
    %13 = vector.broadcast %12 : vector<2x1xf32> to vector<2x8xf32>
    %14 = arith.divf %10, %13 : vector<2x8xf32>
    %c0_6 = arith.constant 0 : index
    %c0_7 = arith.constant 0 : index
    %15 = vector.load %arg3[%c0_6, %c0_7] : memref<2x8xf32, #tpu.memory_space<vmem>>, vector<2x8xf32>
    tpu.vector_store %arg3[%c0_6, %c0_7], %14 {strides = array<i32>} : memref<2x8xf32, #tpu.memory_space<vmem>>, vector<2x8xf32>,
    return
  }
  func.func @transform_0(%arg0: i32) -> (i32, i32, i32) {
    %c0_i32 = arith.constant 0 : i32
    %c0_i32_0 = arith.constant 0 : i32
    %c0_i32_1 = arith.constant 0 : i32
    return %arg0, %c0_i32, %c0_i32_0 : i32, i32, i32
  }
  func.func @transform_1(%arg0: i32) -> (i32, i32) {
    %c0_i32 = arith.constant 0 : i32
    %c0_i32_0 = arith.constant 0 : i32
    return %arg0, %c0_i32 : i32, i32
  }
  func.func @transform_2(%arg0: i32) -> (i32, i32) {
    %c0_i32 = arith.constant 0 : i32
    %c0_i32_0 = arith.constant 0 : i32
    return %arg0, %c0_i32 : i32, i32
  }
}

</mosaic_0001>

<bundles_post_ra>
// kernel: tpu_custom_call.1
= control target key start
LH: loop header
LB: loop body
LE: loop exit
PB: predicated region body
PF: predicated region fallthrough
CT: control target
= control target key end

     0   :  { %7 = vsyncpa [#allocation3], 0  ;;  %s319_s0 = inlined_call_operand.hbm [shape: f32[2,8,32], index: 0, kind: input, shape index: {}]   ;;  %s320_s1 = inlined_call_operand.hbm [shape: f32[2,32], index: 1, kind: input, shape index: {}]   ;;  %s321_s2 = inlined_call_operand.hbm [shape: f32[2,8], index: 2, kind: output, shape index: {}]  }
   0x1   :  { %8 = vsyncpa [#allocation6], 0 }
   0x2   :  { %9 = vsyncpa [#allocation4], 0  ;;  %s274_s9 = smov [#allocation2]  }
   0x3   :  { %s15_s10 = sshll.u32 %s274_s9, 4  ;;  %s16_s10 = int_to_ptr.vmem [resolvable:$true] %s15_s10 }
   0x4   :  { %s216_s11 = scalar_lea.vmem %s16_s10, 256  ;;  %p221_p1 = scmp.lt.s32.totalorder %s16_s10, %s16_s10 }
   0x5   :  { %p217_p0 = scmp.ne.s32.totalorder %s16_s10, %s216_s11  ;;  %p222_p2 = scmp.lt.s32.totalorder %s216_s11, %s216_s11 }
   0x7   :  { %p223_p3 = por %p222_p2, %p221_p1 }
   0x9   :  { %p224_p4 = pnand %p223_p3, %p217_p0 }
   0xb   :  { %227 = shalt.err (!%p224_p4)
}
   0xc   :  { %s275_s12 = smov 128   ;;  %s276_s13 = smov 8  }
   0xd   :  { %21 = dma.hbm_to_vmem [thread:$0]  %s319_s0, 256, %s16_s10, [#allocation3], %s275_s12, %s275_s12, %s276_s13  }
   0xe   :  { %s277_s16 = smov [#allocation5]  }
   0xf   :  { %s28_s17 = sshll.u32 %s277_s16, 4  ;;  %s29_s17 = int_to_ptr.vmem [resolvable:$true] %s28_s17 }
  0x10   :  { %s236_s18 = scalar_lea.vmem %s29_s17, 32  ;;  %p241_p6 = scmp.lt.s32.totalorder %s29_s17, %s29_s17 }
  0x11   :  { %p237_p5 = scmp.ne.s32.totalorder %s29_s17, %s236_s18  ;;  %p242_p7 = scmp.lt.s32.totalorder %s236_s18, %s236_s18 }
  0x13   :  { %p243_p8 = por %p242_p7, %p241_p6 }
  0x15   :  { %p244_p9 = pnand %p243_p8, %p237_p5 }
  0x17   :  { %247 = shalt.err (!%p244_p9)
}
  0x18   :  { %31 = dma.hbm_to_vmem [thread:$0]  %s320_s1, 32, %s29_s17, [#allocation6]  }
  0x19   :  { %268 = dma.done.wait [#allocation3], 256  }
  0x1a   :  { %269 = vsyncadd [#allocation3], 4294967040 }
  0x1b   :  { %270 = dma.done.wait [#allocation6], 32  }
  0x1c   :  { %271 = vsyncadd [#allocation6], 4294967264  ;;  %v53_v0 = vlaneseq  ;;  %v278_v1 = vmov 1966171168   ;;  %v38_v12 = vld [vmem:[#allocation2] sm:$0xff]  ;;  %vm76_vm0 = vcmask 261120  }
  0x1d   :  { %v51_v2 = vunpack.c.l.s4 %v278_v1  ;;  %v190_v9 = vld.sshfl [vmem:[#allocation5] sm:$0x11 pattern:$0x75316420]  ;;  %v39_v15 = vld [vmem:[#allocation2 + $0x8] sm:$0xff]  ;;  %vm95_vm1 = vcmask 1041409  }
  0x1e   :  { %v54_v3 = vshrl.u32 %v53_v0, 7  ;;  %v86_v4 = vand.u32 127, %v53_v0  ;;  %v49_v10 = vcombine.high %v190_v9, %v190_v9  ;;  %vm98_vm2 = vcmask 58368   ;;  %s280_s0 = smov [#allocation7]  }
  0x1f   :  { %v52_v5 = vunpack.c.0.s8 %v51_v2  ;;  %v279_v27 = vmov 0   ;;  %s180_s1 = sshll.u32 %s280_s0, 4  ;;  %s181_s1 = int_to_ptr.vmem [resolvable:$true] %s180_s1 }
  0x20   :  { %v302_v6 = vsub.s32 %v86_v4, %v54_v3  ;;  %v66_v8 = vsub.s32 0, %v54_v3  ;;  %199 = vset.pattern.permute.xlu0 %v279_v27  ;;  %198 = vset.pattern.permute.xlu1 %v279_v27  ;;  %v109_v28 = vsub.s32 1, %v54_v3  ;;  %s248_s21 = scalar_lea.vmem %s181_s1, 32  ;;  %p253_p11 = scmp.lt.s32.totalorder %s181_s1, %s181_s1 }
  0x21   :  { %v55_v7 = vsub.s32 %v52_v5, %v54_v3  ;;  %p249_p10 = scmp.ne.s32.totalorder %s181_s1, %s248_s21  ;;  %p254_p12 = scmp.lt.s32.totalorder %s248_s21, %s248_s21 }
  0x23   :  { %v56_v11 = vrot.slane %v190_v9, %v55_v7  ;;  %v63_v14 = vrot.slane %v49_v10, %v55_v7  ;;  %p255_p13 = por %p254_p12, %p253_p11 }
  0x25   :  { %v67_v13 = vrot.slane %v56_v11, %v66_v8  ;;  %v71_v17 = vrot.slane %v63_v14, %v66_v8  ;;  %p256_p0 = pnand %p255_p13, %p249_p10 }
  0x27   :  { %v74_v16 = vmul.f32 %v67_v13, %v38_v12  ;;  %v75_v19 = vmul.f32 %v71_v17, %v39_v15 }
  0x29   :  { %v77_v18 = vsel %vm76_vm0, %v74_v16, 0.0  ;;  %v80_v20 = vsel %vm76_vm0, %v75_v19, 0.0 }
  0x2a   :  { %78 = vadd.xlane.f32.xlu0 %v77_v18 }
  0x2e   :  { %81 = vadd.xlane.f32.xlu0 %v80_v20 }
  0xb3   :  { %v79_v21 = vpop.xlane.xlu0 %78 }
  0xb4   :  { %v90_v23 = vrot.slane %v79_v21, %v302_v6 }
  0xb7   :  { %v82_v22 = vpop.xlane.xlu0 %81 }
  0xb8   :  { %v94_v24 = vrot.slane %v82_v22, %v302_v6 }
  0xba   :  { %v96_v25 = vsel %vm95_vm1, %v94_v24, %v90_v23 }
  0xbb   :  { %v99_v26 = vsel %vm98_vm2, %v96_v25, -inf }
  0xbc   :  { %100 = vmax.xlane.f32.xlu1 %v99_v26 }
 0x145   :  { %v101_v29 = vpop.xlane.xlu1 %100 }
 0x146   :  { %v106_v30 = vrot.slane %v101_v29, %v66_v8  ;;  %v110_v31 = vrot.slane %v101_v29, %v109_v28 }
 0x148   :  { %v113_v32 = vsub.f32 %v79_v21, %v106_v30  ;;  %v114_v33 = vsub.f32 %v82_v22, %v110_v31 }
 0x14a   :  { %v115_v34 = vmul.f32 1.442695, %v113_v32  ;;  %v117_v35 = vmul.f32 1.442695, %v114_v33 }
 0x14c   :  { %200 = vpow2.f32 %v115_v34 }
 0x14d   :  { %202 = vpow2.f32 %v117_v35 }
 0x159   :  { %v201_v36 = vpop.eup %200 }
 0x15a   :  { %v203_v37 = vpop.eup %202  ;;  %122 = vperm.xlu1 %198, %v201_v36  }
 0x15b   :  { %125 = vperm.xlu0 %199, %v203_v37  }
 0x1d5   :  { %v123_v38 = vpop.permute.xlu1 %122 }
 0x1d6   :  { %v126_v39 = vpop.permute.xlu0 %125  ;;  %v130_v40 = vrot.slane %v123_v38, %v302_v6 }
 0x1d7   :  { %v134_v41 = vrot.slane %v126_v39, %v302_v6 }
 0x1d9   :  { %v135_v42 = vsel %vm95_vm1, %v134_v41, %v130_v40 }
 0x1da   :  { %v137_v43 = vsel %vm98_vm2, %v135_v42, 0.0 }
 0x1db   :  { %138 = vadd.xlane.f32.xlu1 %v137_v43 }
 0x264   :  { %v139_v44 = vpop.xlane.xlu1 %138 }
 0x265   :  { %v144_v45 = vrot.slane %v139_v44, %v66_v8  ;;  %v148_v46 = vrot.slane %v139_v44, %v109_v28 }
 0x267   :  { %204 = vrcp.f32 %v144_v45 }
 0x268   :  { %206 = vrcp.f32 %v148_v46 }
 0x274   :  { %v205_v47 = vpop.eup %204 }
 0x275   :  { %v152_v48 = vmul.f32 %v205_v47, %v201_v36  ;;  %v207_v49 = vpop.eup %206 }
 0x276   :  { %v154_v50 = vmul.f32 %v207_v49, %v203_v37 }
 0x277   :  { %158 = vperm.xlu0 %199, %v152_v48  }
 0x27b   :  { %161 = vperm.xlu0 %199, %v154_v50  }
 0x2f2   :  { %v159_v51 = vpop.permute.xlu0 %158 }
 0x2f3   :  { %v166_v53 = vrot.slane %v159_v51, %v302_v6 }
 0x2f6   :  { %v162_v52 = vpop.permute.xlu0 %161 }
 0x2f7   :  { %v170_v54 = vrot.slane %v162_v52, %v302_v6 }
 0x2f9   :  { %v171_v55 = vsel %vm95_vm1, %v170_v54, %v166_v53 }
 0x2fa   :  { %173 = vst.msk [vmem:[#allocation7] sm:$0x3] %vm98_vm2, %v171_v55 }
 0x2fb   :  { %259 = shalt.err (!%p256_p0)
}
 0x2fc   :  { %183 = dma.vmem_to_hbm [thread:$0]  %s181_s1, 32, %s321_s2, [#allocation4]  }
 0x2fd   :  { %272 = dma.done.wait [#allocation4], 32  }
 0x2fe   :  { %273 = vsyncadd [#allocation4], 4294967264 }
 0x2ff   :  { %187 = vsyncpa [#allocation3], 1 }
 0x300   :  { %188 = vsyncpa [#allocation6], 1 }
 0x301   :  { %189 = vsyncpa [#allocation4], 1 }

</bundles_post_ra>
